<compile_context>
chip_gen: v7x
topology: tpu7x:2x2x1
jax: 0.10.0
libtpu: 0.0.40
codegen_flags: <defaults>
</compile_context>

<pallas_src>
import functools

import jax
import jax.numpy as jnp
from jax.experimental import pallas as pl
from jax.experimental.pallas import tpu as pltpu

LANE = 128
_DEFAULT_BLOCK_B = 2048   # bandwidth/overhead-sized batch tile (not MXU-sized)
_SPLIT_THRESHOLD = 256    # below this a single block is cheapest everywhere


def _round_up(n, m):
    return (n + m - 1) // m * m


def prepare_linear_params(weight, bias, *, dtype=None, pad_to_lanes=False,
                          lane=LANE):
    """One-time prep of nn.Linear params for the Pallas kernel.

    weight: [N, D] (PyTorch layout), bias: [N].
    Returns weight_t [D, N'] and bias_t [1, N'] with N' == N (default, narrow
    output writeback) or N' == round_up(N, 128) when pad_to_lanes=True
    (lane-dense output store, 16x larger writeback for N == 8).
    Optionally casts to `dtype` (e.g. jnp.bfloat16); the kernel always
    accumulates in f32 on the MXU.
    """
    n, d = weight.shape
    dtype = dtype or weight.dtype
    n_out = _round_up(max(n, lane), lane) if pad_to_lanes else n
    w_t = jnp.zeros((d, n_out), dtype).at[:, :n].set(weight.T.astype(dtype))
    b_t = jnp.zeros((1, n_out), dtype).at[0, :n].set(bias.astype(dtype))
    return w_t, b_t


def _linear_kernel(x_ref, w_ref, b_ref, o_ref):
    # x: (tb, D), w: (D, N'), b: (1, N')  ->  x @ W + b, f32 accumulate.
    acc = jnp.dot(x_ref[...], w_ref[...], preferred_element_type=jnp.float32)
    o_ref[...] = (acc + b_ref[...].astype(jnp.float32)).astype(o_ref.dtype)


def _dropout_linear_kernel(u_ref, x_ref, w_ref, b_ref, o_ref, *, rate):
    # torch.nn.Dropout: keep with prob 1-p, scale kept values by 1/(1-p).
    # 1/(1-p) is folded directly into the select branch (one mul + one sel).
    inv_keep = 1.0 / (1.0 - rate)
    x = jnp.where(u_ref[...] >= jnp.float32(rate),
                  x_ref[...].astype(jnp.float32) * jnp.float32(inv_keep),
                  jnp.float32(0.0))
    acc = jnp.dot(x, w_ref[...], preferred_element_type=jnp.float32)
    o_ref[...] = (acc + b_ref[...].astype(jnp.float32)).astype(o_ref.dtype)


def intent_classifier(x, weight_t, bias_t, num_labels, *, dropout_rate=0.0,
                      training=False, dropout_rng=None,
                      block_b=_DEFAULT_BLOCK_B, out_dtype=None):
    """Forward pass of IntentClassifier: linear(dropout(x)).

    x:        [B, D]
    weight_t: [D, N']   (from prepare_linear_params; PyTorch [N, D] transposed)
    bias_t:   [1, N']
    returns   [B, num_labels]
    """
    if not (0.0 <= dropout_rate < 1.0):
        raise ValueError(f"dropout_rate must be in [0, 1), got {dropout_rate}")
    B, D = x.shape
    d_w, n_out = weight_t.shape
    if d_w != D:
        raise ValueError(f"weight_t is [{d_w}, {n_out}], expected [D={D}, N]")
    apply_dropout = bool(training) and dropout_rate > 0.0
    if apply_dropout and dropout_rng is None:
        raise ValueError("training-mode dropout needs dropout_rng")
    out_dtype = out_dtype or x.dtype

    # Batch tiling: single block for small B; otherwise >= 2 "parallel" grid
    # steps (v7x has 2 TensorCores; harmless on 1-TC v5e/v6e), capped at a
    # bandwidth-sized tile.  Ragged last block is clipped by Pallas (no pad).
    if B <= _SPLIT_THRESHOLD:
        tb = B
    else:
        tb = min(_round_up(block_b, 8), _round_up(pl.cdiv(B, 2), 8))
    nb = pl.cdiv(B, tb)

    x_spec = pl.BlockSpec((tb, D), lambda i: (i, 0))       # streams through HBM
    w_spec = pl.BlockSpec((D, n_out), lambda i: (0, 0))    # resident across grid
    b_spec = pl.BlockSpec((1, n_out), lambda i: (0, 0))    # resident across grid
    o_spec = pl.BlockSpec((tb, n_out), lambda i: (i, 0))

    if apply_dropout:
        kernel = functools.partial(_dropout_linear_kernel,
                                   rate=float(dropout_rate))
        u = jax.random.uniform(dropout_rng, (B, D), dtype=jnp.float32)
        args = (u, x, weight_t, bias_t)
        in_specs = [pl.BlockSpec((tb, D), lambda i: (i, 0)),
                    x_spec, w_spec, b_spec]
    else:
        kernel = _linear_kernel
        args = (x, weight_t, bias_t)
        in_specs = [x_spec, w_spec, b_spec]

    out = pl.pallas_call(
        kernel,
        out_shape=jax.ShapeDtypeStruct((B, n_out), out_dtype),
        grid=(nb,),
        in_specs=in_specs,
        out_specs=o_spec,
        compiler_params=pltpu.CompilerParams(
            dimension_semantics=("parallel",)),
    )(*args)

    return out if n_out == num_labels else out[:, :num_labels]


if __name__ == "__main__":
    key = jax.random.PRNGKey(0)
    k_x, k_w, k_b, k_x2, k_drop = jax.random.split(key, 5)

    input_dim = 32
    num_intent_labels = 8

    # Deterministic params (mimic nn.Linear uniform(-1/sqrt(D), 1/sqrt(D))).
    bound = 1.0 / (input_dim ** 0.5)
    weight = jax.random.uniform(k_w, (num_intent_labels, input_dim),
                                minval=-bound, maxval=bound, dtype=jnp.float32)
    bias = jax.random.uniform(k_b, (num_intent_labels,),
                              minval=-bound, maxval=bound, dtype=jnp.float32)

    # One-time param prep: transpose to [D, N], narrow (unpadded) output.
    w_t, b_t = prepare_linear_params(weight, bias)

    # --- 1) module-default tiny eval batch (single block) ---
    B = 2
    x = jax.random.normal(k_x, (B, input_dim), dtype=jnp.float32)
    out = jax.block_until_ready(
        intent_classifier(x, w_t, b_t, num_intent_labels))
    ref = x @ weight.T + bias
    assert out.shape == (B, num_intent_labels)
    assert jnp.allclose(out, ref, atol=1e-5, rtol=1e-5)

    # --- 2) larger batch: 2-step "parallel" grid with a ragged last block ---
    B2 = 1000   # deliberately NOT a multiple of the tile -> cdiv/clip path
    x2 = jax.random.normal(k_x2, (B2, input_dim), dtype=jnp.float32)
    out2 = jax.block_until_ready(
        intent_classifier(x2, w_t, b_t, num_intent_labels))
    ref2 = x2 @ weight.T + bias
    assert out2.shape == (B2, num_intent_labels)
    assert jnp.allclose(out2, ref2, atol=1e-4, rtol=1e-4)

    # --- 3) training-mode dropout: exact check (mask rebuilt from same key) ---
    p = 0.5
    out3 = jax.block_until_ready(
        intent_classifier(x2, w_t, b_t, num_intent_labels,
                          dropout_rate=p, training=True, dropout_rng=k_drop))
    u = jax.random.uniform(k_drop, (B2, input_dim), dtype=jnp.float32)
    ref3 = jnp.where(u >= p, x2 / (1.0 - p), 0.0) @ weight.T + bias
    assert out3.shape == (B2, num_intent_labels)
    assert jnp.allclose(out3, ref3, atol=1e-4, rtol=1e-4)

    # --- 4) bf16 params + activations (f32 MXU accumulation) ---
    w_bf, b_bf = prepare_linear_params(weight, bias, dtype=jnp.bfloat16)
    x_bf = x2.astype(jnp.bfloat16)
    out4 = jax.block_until_ready(
        intent_classifier(x_bf, w_bf, b_bf, num_intent_labels))
    ref4 = (x_bf.astype(jnp.float32) @ w_bf.astype(jnp.float32)
            + b_bf.astype(jnp.float32))
    assert out4.shape == (B2, num_intent_labels)
    assert jnp.allclose(out4.astype(jnp.float32), ref4, atol=3e-2, rtol=3e-2)

    # --- 5) lane-dense padded-output variant still works ---
    w_p, b_p = prepare_linear_params(weight, bias, pad_to_lanes=True)
    out5 = jax.block_until_ready(
        intent_classifier(x, w_p, b_p, num_intent_labels))
    assert out5.shape == (B, num_intent_labels)
    assert jnp.allclose(out5, ref, atol=1e-5, rtol=1e-5)

    print("KERNEL_OK")
</pallas_src>

<mosaic_0001>
module attributes {stable_mosaic.version = 11 : i64} {
  func.func @_linear_kernel(%arg0: i32, %arg1: memref<2x32xf32, #tpu.memory_space<vmem>>, %arg2: memref<32x8xf32, #tpu.memory_space<vmem>>, %arg3: memref<1x8xf32, #tpu.memory_space<vmem>>, %arg4: memref<2x8xf32, #tpu.memory_space<vmem>>) attributes {dimension_semantics = [#tpu.dimension_semantics<parallel>], iteration_bounds = array<i64: 1>, scalar_prefetch = 0 : i64, scratch_operands = 0 : i64, tpu.core_type = #tpu.core_type<tc>, window_params = [{transform_indices = @transform_0, window_bounds = array<i64: 2, 32>}, {pipeline_mode = #tpu.pipeline_mode<synchronous>, transform_indices = @transform_1, window_bounds = array<i64: 32, 8>}, {pipeline_mode = #tpu.pipeline_mode<synchronous>, transform_indices = @transform_2, window_bounds = array<i64: 1, 8>}, {transform_indices = @transform_3, window_bounds = array<i64: 2, 8>}]} {
    %c0 = arith.constant 0 : index
    %c0_0 = arith.constant 0 : index
    %0 = vector.load %arg1[%c0, %c0_0] : memref<2x32xf32, #tpu.memory_space<vmem>>, vector<2x32xf32>
    %c0_1 = arith.constant 0 : index
    %c0_2 = arith.constant 0 : index
    %1 = vector.load %arg2[%c0_1, %c0_2] : memref<32x8xf32, #tpu.memory_space<vmem>>, vector<32x8xf32>
    %cst = arith.constant dense<0.000000e+00> : vector<2x8xf32>
    %2 = tpu.matmul %0, %1, %cst {dimension_numbers = #tpu.dot_dimension_numbers<[1], [0], [0], [1], [0, 0, 1, 1], [], []>} : vector<2x32xf32>, vector<32x8xf32>, vector<2x8xf32> -> vector<2x8xf32>
    %c0_3 = arith.constant 0 : index
    %c0_4 = arith.constant 0 : index
    %3 = vector.load %arg3[%c0_3, %c0_4] : memref<1x8xf32, #tpu.memory_space<vmem>>, vector<1x8xf32>
    %4 = vector.broadcast %3 : vector<1x8xf32> to vector<2x8xf32>
    %5 = arith.addf %2, %4 : vector<2x8xf32>
    %c0_5 = arith.constant 0 : index
    %c0_6 = arith.constant 0 : index
    %6 = vector.load %arg4[%c0_5, %c0_6] : memref<2x8xf32, #tpu.memory_space<vmem>>, vector<2x8xf32>
    tpu.vector_store %arg4[%c0_5, %c0_6], %5 {strides = array<i32>} : memref<2x8xf32, #tpu.memory_space<vmem>>, vector<2x8xf32>,
    return
  }
  func.func @transform_0(%arg0: i32) -> (i32, i32) {
    %c0_i32 = arith.constant 0 : i32
    %c0_i32_0 = arith.constant 0 : i32
    return %arg0, %c0_i32 : i32, i32
  }
  func.func @transform_1(%arg0: i32) -> (i32, i32) {
    %c0_i32 = arith.constant 0 : i32
    %c0_i32_0 = arith.constant 0 : i32
    %c0_i32_1 = arith.constant 0 : i32
    return %c0_i32, %c0_i32_0 : i32, i32
  }
  func.func @transform_2(%arg0: i32) -> (i32, i32) {
    %c0_i32 = arith.constant 0 : i32
    %c0_i32_0 = arith.constant 0 : i32
    %c0_i32_1 = arith.constant 0 : i32
    return %c0_i32, %c0_i32_0 : i32, i32
  }
  func.func @transform_3(%arg0: i32) -> (i32, i32) {
    %c0_i32 = arith.constant 0 : i32
    %c0_i32_0 = arith.constant 0 : i32
    return %arg0, %c0_i32 : i32, i32
  }
}

</mosaic_0001>

<bundles_post_ra>
// kernel: tpu_custom_call.1
= control target key start
LH: loop header
LB: loop body
LE: loop exit
PB: predicated region body
PF: predicated region fallthrough
CT: control target
= control target key end

     0   :  { %v169_v3 = vmov 0.0|0.0   ;;  %vm170_vm0 = vmmov 0   ;;  %v171_v6 = vmov 0.0   ;;  %s223_s0 = inlined_call_operand.vmem [shape: f32[2,32], index: 0, kind: input, shape index: {}]   ;;  %s224_s1 = inlined_call_operand.vmem [shape: f32[32,8], index: 1, kind: input, shape index: {}]   ;;  %s225_s2 = inlined_call_operand.vmem [shape: f32[1,8], index: 2, kind: input, shape index: {}]   ;;  %s226_s3 = inlined_call_operand.hbm [shape: f32[2,8], index: 3, kind: output, shape index: {}]  }
   0x1   :  { %v16_v0 = vld [vmem:[%s224_s1] sm:$0xff]  ;;  %v17_v1 = vld [vmem:[%s224_s1 + $0x8] sm:$0xff]  ;;  %v18_v2 = vld [vmem:[%s224_s1 + $0x10] sm:$0xff]  ;;  %135 = vmatprep.subr.bf16.mxu0 %v169_v3  ;;  %132 = vmatprep.mubr.msk.f32.mxu0 %vm170_vm0, %v171_v6 }
   0x2   :  { %v136_v4 = vpack.c.bf16 %v17_v1, %v16_v0  ;;  %v19_v5 = vld [vmem:[%s224_s1 + $0x18] sm:$0xff] }
   0x3   :  { %8 = vsyncpa [#allocation3], 0  ;;  %v139_v7 = vpack.c.bf16 %v19_v5, %v18_v2  ;;  %v15_v8 = vld [vmem:[%s223_s0] sm:$0x3]  ;;  %vm27_vm1 = vcmask 261120   ;;  %s172_s24 = smov [#allocation2]  }
   0x4   :  { %137 = vmatpush3.bf16.msra.mxu0 %v136_v4  ;;  %v117_v9 = vld [vmem:[%s225_s2] ss:$0 sm:$0xff]  ;;  %s109_s1 = sshll.u32 %s172_s24, 4  ;;  %vm101_vm2 = vcmask 58368   ;;  %s110_s1 = int_to_ptr.vmem [resolvable:$true] %s109_s1 }
   0x5   :  { %138 = vmatprep.subr.bf16.mxu0 %v169_v3  ;;  %s145_s25 = scalar_lea.vmem %s110_s1, 32  ;;  %p150_p1 = scmp.lt.s32.totalorder %s110_s1, %s110_s1 }
   0x6   :  { %p146_p0 = scmp.ne.s32.totalorder %s110_s1, %s145_s25  ;;  %p151_p2 = scmp.lt.s32.totalorder %s145_s25, %s145_s25 }
   0x8   :  { %140 = vmatpush3.bf16.msra.mxu0 %v139_v7  ;;  %p152_p3 = por %p151_p2, %p150_p1 }
   0xa   :  { %p153_p4 = pnand %p152_p3, %p146_p0 }
   0xb   :  { %133 = vmatmul.mubr.msk.f32.vlgmr.msra.gmra.mrb[0].mxu0 %vm27_vm1, %v15_v8 }
  0xde   :  { %v97_v10 = vpop.f32.mrb[0].mxu0 }
  0xdf   :  { %v98_v11 = vadd.f32 %v117_v9, %v97_v10  ;;  %v134_v12 = vpop.f32.mrb[1].mxu0 }
  0xe1   :  { %102 = vst.msk [vmem:[#allocation2] sm:$0x3] %vm101_vm2, %v98_v11 }
  0xe2   :  { %156 = shalt.err (!%p153_p4)
}
  0xe3   :  { %s157_s27 = scalar_lea.hbm %s226_s3, 32 }
  0xe4   :  { %p158_p5 = scmp.ne.s32.totalorder %s226_s3, %s157_s27  ;;  %p161_p6 = scmp.lt.u32.totalorder %s157_s27, %s226_s3 }
  0xe6   :  { %p163_p7 = pnand %p161_p6, %p158_p5 }
  0xe8   :  { %166 = shalt.err (!%p163_p7)
}
  0xe9   :  { %112 = dma.vmem_to_hbm [thread:$0]  %s110_s1, 32, %s226_s3, [#allocation3]  }
  0xea   :  { %167 = dma.done.wait [#allocation3], 32  }
  0xeb   :  { %168 = vsyncadd [#allocation3], 4294967264 }
  0xec   :  { %116 = vsyncpa [#allocation3], 1 }

</bundles_post_ra>
